<compile_context>
chip_gen: v5e
topology: v5e:2x2
jax: 0.10.0
libtpu: 0.0.40
codegen_flags: <defaults>
</compile_context>

<pallas_src>
import functools

import jax
import jax.numpy as jnp
from jax import lax
from jax.experimental import pallas as pl
from jax.experimental.pallas import tpu as pltpu


def _partial_sums_kernel(x_ref, y_ref, sty_ref, st_ref, sy_ref,
                         acc_ty, acc_t, acc_y, *,
                         tiles_per_split, tile_hw, hw_valid, needs_mask):
    j = pl.program_id(2)

    @pl.when(j == 0)
    def _():
        acc_ty[...] = jnp.zeros_like(acc_ty)
        acc_t[...] = jnp.zeros_like(acc_t)
        acc_y[...] = jnp.zeros_like(acc_y)

    x = x_ref[...].astype(jnp.float32)
    y = y_ref[...].astype(jnp.float32)

    # sigmoid(x) = 0.5 * (tanh(0.5 * x) + 1).  Only t = tanh(0.5*x) and y are
    # streamed through the reductions; the affine is applied once per row in
    # the epilogue (fewer VALU ops per element, single EUP transcendental).
    t = jnp.tanh(0.5 * x)

    if needs_mask:
        # Ragged tail tile and/or the duplicated (clamped) tile of an uneven
        # split: any column whose *unclamped* global position is >= H*W must
        # contribute exactly zero to all three sums.
        g = pl.program_id(0) * tiles_per_split + j     # unclamped tile index
        col = g * tile_hw + lax.broadcasted_iota(jnp.int32, x.shape, 1)
        valid = (col < hw_valid).astype(jnp.float32)
        t = t * valid
        y = y * valid

    acc_ty[...] += jnp.sum(t * y, axis=-1, keepdims=True)
    acc_t[...] += jnp.sum(t, axis=-1, keepdims=True)
    acc_y[...] += jnp.sum(y, axis=-1, keepdims=True)

    @pl.when(j == pl.num_programs(2) - 1)
    def _():
        sty_ref[0] = acc_ty[...]
        st_ref[0] = acc_t[...]
        sy_ref[0] = acc_y[...]


def _largest_tile(total, align, max_tile):
    """Largest multiple of `align` that divides `total` and is <= max_tile.
    Falls back to the full extent when `total` is not a multiple of `align`
    (a full-extent block dim is always legal)."""
    if total % align != 0:
        return total
    best = align
    cap = min(total, max_tile)
    t = align
    while t <= cap:
        if total % t == 0:
            best = t
        t += align
    return best


def log_cosh_dice_loss(outputs, targets, *, smooth_nr=1e-5, smooth_dr=1e-5,
                       target_block_bytes=4 * 1024 * 1024):
    """outputs, targets: (B, C, H, W). Returns scalar f32 loss."""
    B, C, H, W = outputs.shape
    assert targets.shape == outputs.shape
    BC, HW = B * C, H * W

    # Keep original dtypes until VMEM (kernel upcasts to f32 internally).
    x = outputs.reshape(BC, HW)
    y = targets.reshape(BC, HW)

    itemsize = max(jnp.dtype(outputs.dtype).itemsize,
                   jnp.dtype(targets.dtype).itemsize)

    # Row (BC) tile: aligned to the dtype's native sublane packing (8 f32,
    # 16 bf16/f16, 32 int8), capped at 64; full-extent fallback otherwise.
    sublane = max(8, 32 // itemsize)
    tile_bc = _largest_tile(BC, sublane, 64)
    bc_tiles = BC // tile_bc          # exact by construction (fallback -> 1)

    # Spatial tile: multiple of 128 sized for ~target_block_bytes per input
    # block (2 inputs x 2 pipeline buffers stays well inside VMEM on every
    # chip).  Ragged tails are masked in-kernel instead of collapsing to a
    # giant full-extent block.
    target_elems = max(128, target_block_bytes // (tile_bc * itemsize))
    tile_hw_cap = max(128, (target_elems // 128) * 128)
    if HW <= tile_hw_cap:
        tile_hw = HW
        num_hw_tiles = 1
    else:
        tile_hw = tile_hw_cap
        num_hw_tiles = pl.cdiv(HW, tile_hw)

    # Keep both v7x TensorCores busy when BC fits in one row tile by splitting
    # the spatial reduction into two parallel halves (per-split partial sums,
    # combined in the epilogue).  Harmless on 1-TC chips.
    n_splits = 2 if (bc_tiles == 1 and num_hw_tiles >= 2) else 1
    tiles_per_split = pl.cdiv(num_hw_tiles, n_splits)

    uneven_split = (n_splits * tiles_per_split != num_hw_tiles)
    needs_mask = (num_hw_tiles * tile_hw != HW) or uneven_split

    def in_map(s, i, j):
        g = s * tiles_per_split + j
        if uneven_split:
            # Clamp the duplicated overhang tile onto the last real tile; its
            # contribution is zeroed by the in-kernel mask.
            g = jnp.minimum(g, num_hw_tiles - 1)
        return (i, g)

    def out_map(s, i, j):
        return (s, i, 0)

    grid = (n_splits, bc_tiles, tiles_per_split)

    kernel = functools.partial(
        _partial_sums_kernel,
        tiles_per_split=tiles_per_split,
        tile_hw=tile_hw,
        hw_valid=HW,
        needs_mask=needs_mask,
    )

    part_shape = jax.ShapeDtypeStruct((n_splits, BC, 1), jnp.float32)
    out_block = pl.BlockSpec((1, tile_bc, 1), out_map)

    s_ty, s_t, s_y = pl.pallas_call(
        kernel,
        out_shape=(part_shape, part_shape, part_shape),
        grid_spec=pltpu.PrefetchScalarGridSpec(
            num_scalar_prefetch=0,
            grid=grid,
            in_specs=[
                pl.BlockSpec((tile_bc, tile_hw), in_map),
                pl.BlockSpec((tile_bc, tile_hw), in_map),
            ],
            out_specs=[out_block, out_block, out_block],
            scratch_shapes=[
                pltpu.VMEM((tile_bc, 1), jnp.float32),  # sum(t * y)
                pltpu.VMEM((tile_bc, 1), jnp.float32),  # sum(t)
                pltpu.VMEM((tile_bc, 1), jnp.float32),  # sum(y)
            ],
        ),
        compiler_params=pltpu.CompilerParams(
            dimension_semantics=("parallel", "parallel", "arbitrary"),
            vmem_limit_bytes=48 * 1024 * 1024,
        ),
    )(x, y)

    # Tiny epilogue: combine per-split partials, undo the sigmoid fold, dice,
    # mean over (B, C), log-cosh.
    s_ty = jnp.sum(s_ty, axis=0)[:, 0]
    s_t = jnp.sum(s_t, axis=0)[:, 0]
    s_y = jnp.sum(s_y, axis=0)[:, 0]

    inter = 0.5 * (s_ty + s_y)                 # sum(sigmoid(x) * y)
    denom = 0.5 * s_t + s_y + 0.5 * HW         # sum(sigmoid(x)) + sum(y)
    dice = 1.0 - (2.0 * inter + smooth_nr) / (denom + smooth_dr)
    d = jnp.mean(dice)
    return jnp.log((jnp.exp(d) + jnp.exp(-d)) * 0.5)


def _reference(outputs, targets, smooth_nr=1e-5, smooth_dr=1e-5):
    p = jax.nn.sigmoid(outputs.astype(jnp.float32))
    t = targets.astype(jnp.float32)
    axes = (2, 3)
    inter = jnp.sum(p * t, axis=axes)
    denom = jnp.sum(t, axis=axes) + jnp.sum(p, axis=axes)
    dice = 1.0 - (2.0 * inter + smooth_nr) / (denom + smooth_dr)
    d = jnp.mean(dice)
    return jnp.log((jnp.exp(d) + jnp.exp(-d)) / 2.0)


if __name__ == "__main__":
    key = jax.random.PRNGKey(0)
    k1, k2, k3, k4 = jax.random.split(key, 4)

    # Primary case (module-typical small shape).
    B, C, H, W = 2, 4, 16, 16
    outputs = jax.random.normal(k1, (B, C, H, W), dtype=jnp.float32)
    targets = (jax.random.uniform(k2, (B, C, H, W)) > 0.5).astype(jnp.float32)
    loss = jax.block_until_ready(log_cosh_dice_loss(outputs, targets))
    ref = jax.block_until_ready(_reference(outputs, targets))
    assert jnp.allclose(loss, ref, atol=1e-5, rtol=1e-5), (loss, ref)

    # Ragged-spatial case: forces multi-tile spatial grid, the 2-way parallel
    # split, the clamped duplicate tile, and in-kernel tail masking.
    B2, C2, H2, W2 = 2, 3, 19, 19
    out2 = jax.random.normal(k3, (B2, C2, H2, W2), dtype=jnp.float32)
    tgt2 = (jax.random.uniform(k4, (B2, C2, H2, W2)) > 0.5).astype(jnp.float32)
    loss2 = jax.block_until_ready(
        log_cosh_dice_loss(out2, tgt2, target_block_bytes=3072))
    ref2 = jax.block_until_ready(_reference(out2, tgt2))
    assert jnp.allclose(loss2, ref2, atol=1e-5, rtol=1e-5), (loss2, ref2)

    print("KERNEL_OK")
</pallas_src>

<mosaic_0001>
module attributes {stable_mosaic.version = 11 : i64} {
  func.func @_partial_sums_kernel(%arg0: i32, %arg1: i32, %arg2: i32, %arg3: memref<8x256xf32, #tpu.memory_space<vmem>>, %arg4: memref<8x256xf32, #tpu.memory_space<vmem>>, %arg5: memref<1x8x1xf32, #tpu.memory_space<vmem>>, %arg6: memref<1x8x1xf32, #tpu.memory_space<vmem>>, %arg7: memref<1x8x1xf32, #tpu.memory_space<vmem>>, %arg8: memref<8x1xf32, #tpu.memory_space<vmem>>, %arg9: memref<8x1xf32, #tpu.memory_space<vmem>>, %arg10: memref<8x1xf32, #tpu.memory_space<vmem>>) attributes {dimension_semantics = [#tpu.dimension_semantics<parallel>, #tpu.dimension_semantics<parallel>, #tpu.dimension_semantics<arbitrary>], iteration_bounds = array<i64: 1, 1, 1>, scalar_prefetch = 0 : i64, scratch_operands = 3 : i64, tpu.core_type = #tpu.core_type<tc>, window_params = [{transform_indices = @transform_0, window_bounds = array<i64: 8, 256>}, {transform_indices = @transform_1, window_bounds = array<i64: 8, 256>}, {transform_indices = @transform_2, window_bounds = array<i64: 1, 8, 1>}, {transform_indices = @transform_3, window_bounds = array<i64: 1, 8, 1>}, {transform_indices = @transform_4, window_bounds = array<i64: 1, 8, 1>}]} {
    %c0_i32 = arith.constant 0 : i32
    %0 = arith.cmpi eq, %arg2, %c0_i32 : i32
    %1 = arith.extui %0 : i1 to i32
    %c0_i32_0 = arith.constant 0 : i32
    %2 = arith.cmpi ne, %1, %c0_i32_0 : i32
    scf.if %2 {
      %cst_21 = arith.constant 0.000000e+00 : f32
      %27 = vector.broadcast %cst_21 : f32 to vector<8x1xf32>
      %c0_22 = arith.constant 0 : index
      %c0_23 = arith.constant 0 : index
      %28 = vector.load %arg8[%c0_22, %c0_23] : memref<8x1xf32, #tpu.memory_space<vmem>>, vector<8x1xf32>
      tpu.vector_store %arg8[%c0_22, %c0_23], %27 {strides = array<i32>} : memref<8x1xf32, #tpu.memory_space<vmem>>, vector<8x1xf32>,
      %cst_24 = arith.constant 0.000000e+00 : f32
      %29 = vector.broadcast %cst_24 : f32 to vector<8x1xf32>
      %c0_25 = arith.constant 0 : index
      %c0_26 = arith.constant 0 : index
      %30 = vector.load %arg9[%c0_25, %c0_26] : memref<8x1xf32, #tpu.memory_space<vmem>>, vector<8x1xf32>
      tpu.vector_store %arg9[%c0_25, %c0_26], %29 {strides = array<i32>} : memref<8x1xf32, #tpu.memory_space<vmem>>, vector<8x1xf32>,
      %cst_27 = arith.constant 0.000000e+00 : f32
      %31 = vector.broadcast %cst_27 : f32 to vector<8x1xf32>
      %c0_28 = arith.constant 0 : index
      %c0_29 = arith.constant 0 : index
      %32 = vector.load %arg10[%c0_28, %c0_29] : memref<8x1xf32, #tpu.memory_space<vmem>>, vector<8x1xf32>
      tpu.vector_store %arg10[%c0_28, %c0_29], %31 {strides = array<i32>} : memref<8x1xf32, #tpu.memory_space<vmem>>, vector<8x1xf32>,
    } else {
    }
    %c0 = arith.constant 0 : index
    %c0_1 = arith.constant 0 : index
    %3 = vector.load %arg3[%c0, %c0_1] : memref<8x256xf32, #tpu.memory_space<vmem>>, vector<8x256xf32>
    %c0_2 = arith.constant 0 : index
    %c0_3 = arith.constant 0 : index
    %4 = vector.load %arg4[%c0_2, %c0_3] : memref<8x256xf32, #tpu.memory_space<vmem>>, vector<8x256xf32>
    %cst = arith.constant 5.000000e-01 : f32
    %5 = vector.broadcast %cst : f32 to vector<8x256xf32>
    %6 = arith.mulf %5, %3 : vector<8x256xf32>
    %7 = math.tanh %6 : vector<8x256xf32>
    %c0_4 = arith.constant 0 : index
    %c0_5 = arith.constant 0 : index
    %8 = vector.load %arg8[%c0_4, %c0_5] : memref<8x1xf32, #tpu.memory_space<vmem>>, vector<8x1xf32>
    %9 = arith.mulf %7, %4 : vector<8x256xf32>
    %cst_6 = arith.constant dense<0.000000e+00> : vector<8xf32>
    %10 = vector.multi_reduction <add>, %9, %cst_6 [1] : vector<8x256xf32> to vector<8xf32>
    %11 = vector.shape_cast %10 : vector<8xf32> to vector<8x1xf32>
    %12 = arith.addf %8, %11 : vector<8x1xf32>
    %c0_7 = arith.constant 0 : index
    %c0_8 = arith.constant 0 : index
    %13 = vector.load %arg8[%c0_7, %c0_8] : memref<8x1xf32, #tpu.memory_space<vmem>>, vector<8x1xf32>
    tpu.vector_store %arg8[%c0_7, %c0_8], %12 {strides = array<i32>} : memref<8x1xf32, #tpu.memory_space<vmem>>, vector<8x1xf32>,
    %c0_9 = arith.constant 0 : index
    %c0_10 = arith.constant 0 : index
    %14 = vector.load %arg9[%c0_9, %c0_10] : memref<8x1xf32, #tpu.memory_space<vmem>>, vector<8x1xf32>
    %cst_11 = arith.constant dense<0.000000e+00> : vector<8xf32>
    %15 = vector.multi_reduction <add>, %7, %cst_11 [1] : vector<8x256xf32> to vector<8xf32>
    %16 = vector.shape_cast %15 : vector<8xf32> to vector<8x1xf32>
    %17 = arith.addf %14, %16 : vector<8x1xf32>
    %c0_12 = arith.constant 0 : index
    %c0_13 = arith.constant 0 : index
    %18 = vector.load %arg9[%c0_12, %c0_13] : memref<8x1xf32, #tpu.memory_space<vmem>>, vector<8x1xf32>
    tpu.vector_store %arg9[%c0_12, %c0_13], %17 {strides = array<i32>} : memref<8x1xf32, #tpu.memory_space<vmem>>, vector<8x1xf32>,
    %c0_14 = arith.constant 0 : index
    %c0_15 = arith.constant 0 : index
    %19 = vector.load %arg10[%c0_14, %c0_15] : memref<8x1xf32, #tpu.memory_space<vmem>>, vector<8x1xf32>
    %cst_16 = arith.constant dense<0.000000e+00> : vector<8xf32>
    %20 = vector.multi_reduction <add>, %4, %cst_16 [1] : vector<8x256xf32> to vector<8xf32>
    %21 = vector.shape_cast %20 : vector<8xf32> to vector<8x1xf32>
    %22 = arith.addf %19, %21 : vector<8x1xf32>
    %c0_17 = arith.constant 0 : index
    %c0_18 = arith.constant 0 : index
    %23 = vector.load %arg10[%c0_17, %c0_18] : memref<8x1xf32, #tpu.memory_space<vmem>>, vector<8x1xf32>
    tpu.vector_store %arg10[%c0_17, %c0_18], %22 {strides = array<i32>} : memref<8x1xf32, #tpu.memory_space<vmem>>, vector<8x1xf32>,
    %c0_i32_19 = arith.constant 0 : i32
    %24 = arith.cmpi eq, %arg2, %c0_i32_19 : i32
    %25 = arith.extui %24 : i1 to i32
    %c0_i32_20 = arith.constant 0 : i32
    %26 = arith.cmpi ne, %25, %c0_i32_20 : i32
    scf.if %26 {
      %c0_21 = arith.constant 0 : index
      %c0_22 = arith.constant 0 : index
      %27 = vector.load %arg8[%c0_21, %c0_22] : memref<8x1xf32, #tpu.memory_space<vmem>>, vector<8x1xf32>
      %c0_23 = arith.constant 0 : index
      %c0_24 = arith.constant 0 : index
      %c0_25 = arith.constant 0 : index
      %28 = vector.load %arg5[%c0_23, %c0_24, %c0_25] : memref<1x8x1xf32, #tpu.memory_space<vmem>>, vector<1x8x1xf32>
      %29 = vector.shape_cast %28 : vector<1x8x1xf32> to vector<8x1xf32>
      %30 = vector.shape_cast %27 : vector<8x1xf32> to vector<1x8x1xf32>
      tpu.vector_store %arg5[%c0_23, %c0_24, %c0_25], %30 {strides = array<i32>} : memref<1x8x1xf32, #tpu.memory_space<vmem>>, vector<1x8x1xf32>,
      %c0_26 = arith.constant 0 : index
      %c0_27 = arith.constant 0 : index
      %31 = vector.load %arg9[%c0_26, %c0_27] : memref<8x1xf32, #tpu.memory_space<vmem>>, vector<8x1xf32>
      %c0_28 = arith.constant 0 : index
      %c0_29 = arith.constant 0 : index
      %c0_30 = arith.constant 0 : index
      %32 = vector.load %arg6[%c0_28, %c0_29, %c0_30] : memref<1x8x1xf32, #tpu.memory_space<vmem>>, vector<1x8x1xf32>
      %33 = vector.shape_cast %32 : vector<1x8x1xf32> to vector<8x1xf32>
      %34 = vector.shape_cast %31 : vector<8x1xf32> to vector<1x8x1xf32>
      tpu.vector_store %arg6[%c0_28, %c0_29, %c0_30], %34 {strides = array<i32>} : memref<1x8x1xf32, #tpu.memory_space<vmem>>, vector<1x8x1xf32>,
      %c0_31 = arith.constant 0 : index
      %c0_32 = arith.constant 0 : index
      %35 = vector.load %arg10[%c0_31, %c0_32] : memref<8x1xf32, #tpu.memory_space<vmem>>, vector<8x1xf32>
      %c0_33 = arith.constant 0 : index
      %c0_34 = arith.constant 0 : index
      %c0_35 = arith.constant 0 : index
      %36 = vector.load %arg7[%c0_33, %c0_34, %c0_35] : memref<1x8x1xf32, #tpu.memory_space<vmem>>, vector<1x8x1xf32>
      %37 = vector.shape_cast %36 : vector<1x8x1xf32> to vector<8x1xf32>
      %38 = vector.shape_cast %35 : vector<8x1xf32> to vector<1x8x1xf32>
      tpu.vector_store %arg7[%c0_33, %c0_34, %c0_35], %38 {strides = array<i32>} : memref<1x8x1xf32, #tpu.memory_space<vmem>>, vector<1x8x1xf32>,
    } else {
    }
    return
  }
  func.func @transform_0(%arg0: i32, %arg1: i32, %arg2: i32) -> (i32, i32) {
    %c1_i32 = arith.constant 1 : i32
    %0 = arith.muli %arg0, %c1_i32 : i32
    %1 = arith.addi %0, %arg2 : i32
    %c0_i32 = arith.constant 0 : i32
    return %arg1, %1 : i32, i32
  }
  func.func @transform_1(%arg0: i32, %arg1: i32, %arg2: i32) -> (i32, i32) {
    %c1_i32 = arith.constant 1 : i32
    %0 = arith.muli %arg0, %c1_i32 : i32
    %1 = arith.addi %0, %arg2 : i32
    %c0_i32 = arith.constant 0 : i32
    return %arg1, %1 : i32, i32
  }
  func.func @transform_2(%arg0: i32, %arg1: i32, %arg2: i32) -> (i32, i32, i32) {
    %c0_i32 = arith.constant 0 : i32
    %c0_i32_0 = arith.constant 0 : i32
    return %arg0, %arg1, %c0_i32 : i32, i32, i32
  }
  func.func @transform_3(%arg0: i32, %arg1: i32, %arg2: i32) -> (i32, i32, i32) {
    %c0_i32 = arith.constant 0 : i32
    %c0_i32_0 = arith.constant 0 : i32
    return %arg0, %arg1, %c0_i32 : i32, i32, i32
  }
  func.func @transform_4(%arg0: i32, %arg1: i32, %arg2: i32) -> (i32, i32, i32) {
    %c0_i32 = arith.constant 0 : i32
    %c0_i32_0 = arith.constant 0 : i32
    return %arg0, %arg1, %c0_i32 : i32, i32, i32
  }
}

</mosaic_0001>

<bundles_post_ra>
// kernel: tpu_custom_call.1
= control target key start
LH: loop header
LB: loop body
LE: loop exit
PB: predicated region body
PF: predicated region fallthrough
CT: control target
= control target key end

     0   :  { %10 = vsyncpa [#allocation6], 0  ;;  %s225_s0 = inlined_call_operand.hbm [shape: f32[8,256], index: 0, kind: input, shape index: {}]   ;;  %s226_s1 = inlined_call_operand.hbm [shape: f32[8,256], index: 1, kind: input, shape index: {}]   ;;  %s227_s2 = inlined_call_operand.vmem [shape: f32[1,8,1], index: 2, kind: output, shape index: {0}]   ;;  %s228_s3 = inlined_call_operand.vmem [shape: f32[1,8,1], index: 3, kind: output, shape index: {1}]   ;;  %s229_s4 = inlined_call_operand.vmem [shape: f32[1,8,1], index: 4, kind: output, shape index: {2}]  }
   0x1   :  { %s21_s17 = sshll.u32 %s225_s0, 4  ;;  %s22_s17 = int_to_ptr.hbm [resolvable:$true] %s21_s17 }
   0x2   :  { %11 = vsyncpa [#allocation8], 0  ;;  %s173_s18 = smov [#allocation5]   ;;  %s36_s22 = sshll.u32 %s226_s1, 4  ;;  %s37_s22 = int_to_ptr.hbm [resolvable:$true] %s36_s22 }
   0x3   :  { %s23_s19 = sshll.u32 %s173_s18, 4  ;;  %s174_s23 = smov [#allocation7]   ;;  %s24_s19 = int_to_ptr.vmem [resolvable:$true] %s23_s19 }
   0x4   :  { %26 = dma.hbm_to_vmem [thread:$0]  %s22_s17, 256, %s24_s19, [#allocation6]  }
   0x5   :  { %s38_s24 = sshll.u32 %s174_s23, 4  ;;  %s39_s24 = int_to_ptr.vmem [resolvable:$true] %s38_s24 }
   0x6   :  { %41 = dma.hbm_to_vmem [thread:$0]  %s37_s22, 256, %s39_s24, [#allocation8]  }
   0x7   :  { %169 = dma.done.wait [#allocation6], 256  }
   0x8   :  { %170 = vsyncadd [#allocation6], 4294967040 }
   0x9   :  { %171 = dma.done.wait [#allocation8], 256  }
   0xa   :  { %172 = vsyncadd [#allocation8], 4294967040  ;;  %vm58_vm0 = vcmask 7168   ;;  %v175_v0 = vmov 0.0   ;;  %v62_v1 = vld [vmem:[#allocation5] sm:$0xff]  ;;  %v63_v2 = vld [vmem:[#allocation5 + $0x8] sm:$0xff] }
   0xb   :  { %59 = vst.msk [vmem:[#allocation2] sm:$0xff] %vm58_vm0, %v175_v0  ;;  %v64_v3 = vld [vmem:[#allocation7] sm:$0xff]  ;;  %v65_v4 = vld [vmem:[#allocation7 + $0x8] sm:$0xff]  ;;  %v66_v5 = vmul.f32 0.5, %v62_v1  ;;  %v67_v6 = vmul.f32 0.5, %v63_v2 }
   0xc   :  { %60 = vst.msk [vmem:[#allocation3] sm:$0xff] %vm58_vm0, %v175_v0  ;;  %v86_v7 = vadd.f32 %v65_v4, %v64_v3 }
   0xd   :  { %61 = vst.msk [vmem:[#allocation4] sm:$0xff] %vm58_vm0, %v175_v0  ;;  %117 = vtanh.f32 %v66_v5 }
   0xe   :  { %119 = vtanh.f32 %v67_v6  ;;  %87 = vadd.xlane.f32.xlu1 %v86_v7 }
  0x12   :  { %v70_v17 = vld [vmem:[#allocation2] sm:$0xff] }
  0x13   :  { %v118_v8 = vpop.eup %117  ;;  %v79_v21 = vld [vmem:[#allocation3] sm:$0xff] }
  0x14   :  { %v120_v9 = vpop.eup %119  ;;  %v71_v10 = vmul.f32 %v118_v8, %v64_v3  ;;  %v85_v14 = vld [vmem:[#allocation4] sm:$0xff] }
  0x15   :  { %v72_v11 = vmul.f32 %v120_v9, %v65_v4  ;;  %v80_v13 = vadd.f32 %v120_v9, %v118_v8 }
  0x17   :  { %v73_v12 = vadd.f32 %v72_v11, %v71_v10 }
  0x19   :  { %74 = vadd.xlane.f32.xlu0 %v73_v12 }
  0x21   :  { %81 = vadd.xlane.f32.xlu0 %v80_v13 }
  0x81   :  { %v88_v15 = vpop.xlane.xlu1 %87 }
  0x82   :  { %v89_v16 = vadd.f32 %v88_v15, %v85_v14 }
  0x84   :  { %90 = vst.msk [vmem:[#allocation4] sm:$0xff] %vm58_vm0, %v89_v16 }
  0x8b   :  { %v98_v18 = vld [vmem:[#allocation4] sm:$0xff] }
  0x8c   :  { %v75_v19 = vpop.xlane.xlu0 %74  ;;  %99 = vst.msk [vmem:[%s229_s4] sm:$0xff] %vm58_vm0, %v98_v18 }
  0x8d   :  { %v76_v20 = vadd.f32 %v75_v19, %v70_v17 }
  0x8f   :  { %78 = vst.msk [vmem:[#allocation2] sm:$0xff] %vm58_vm0, %v76_v20 }
  0x94   :  { %v82_v22 = vpop.xlane.xlu0 %81 }
  0x95   :  { %v83_v23 = vadd.f32 %v82_v22, %v79_v21 }
  0x96   :  { %v94_v24 = vld [vmem:[#allocation2] sm:$0xff] }
  0x97   :  { %95 = vst.msk [vmem:[%s227_s2] sm:$0xff] %vm58_vm0, %v94_v24 }
  0x98   :  { %84 = vst.msk [vmem:[#allocation3] sm:$0xff] %vm58_vm0, %v83_v23 }
  0x9f   :  { %v96_v25 = vld [vmem:[#allocation3] sm:$0xff] }
  0xa0   :  { %97 = vst.msk [vmem:[%s228_s3] sm:$0xff] %vm58_vm0, %v96_v25 }
  0xa1   :  { %112 = vsyncpa [#allocation6], 1 }
  0xa2   :  { %113 = vsyncpa [#allocation8], 1 }

</bundles_post_ra>
